<compile_context>
chip_gen: v5e
topology: v5e:2x2
jax: 0.10.0
libtpu: 0.0.40
codegen_flags: <defaults>
</compile_context>

<pallas_src>
import functools

import jax
import jax.numpy as jnp
import numpy as np
from jax.experimental import pallas as pl
from jax.experimental.pallas import tpu as pltpu


def _dilconv_kernel(x_ref, w_ref, b_ref, out_ref, *, tap_offsets, out_rows):
    """One batch element (grid=(N,)).

    x_ref:   (R, Wp*Cin)           pre-ReLU rows (R = Hp for stride==1, KH*Ho pre-gathered else)
    w_ref:   (KH, Wp*Cin, Wo*Cout) banded combined depthwise*pointwise weights (bf16)
    b_ref:   (1, Wo*Cout)          combined bias tiled over ow (f32)
    out_ref: (Ho, Wo*Cout)         output rows for this batch element (f32)
    """
    woc = out_ref.shape[-1]
    # ReLU hoisted out of the tap loop; padding is zero and ReLU(0)==0, so relu-after-pad is OK.
    x = jnp.maximum(x_ref[...], 0.0)
    # Accumulator initialised from the broadcast bias (saves a zero-fill and a post-add).
    acc = jnp.broadcast_to(b_ref[...], (out_rows, woc))
    for k, off in enumerate(tap_offsets):                 # unrolled: KH is small (3)
        rows = jax.lax.slice_in_dim(x, off, off + out_rows, axis=0)   # static contiguous slice
        # bf16 pack kept per-tap (post-slice) so sublane slicing stays on unpacked f32 rows.
        acc = acc + jnp.dot(rows.astype(jnp.bfloat16), w_ref[k],
                            preferred_element_type=jnp.float32)       # MXU, K = Wp*Cin
    out_ref[...] = acc.astype(out_ref.dtype)


def build_dilconv_params(dw_w, dw_b, pw_w, pw_b, *, W, stride, padding, dilation):
    """Parameter-only precompute (call once; does not depend on x).

    dw_w: (KH, KW, Cin)   depthwise weights;  dw_b: (Cin,)
    pw_w: (Cin, Cout)     pointwise weights;  pw_b: (Cout,)
    Returns banded weights B (KH, Wp*Cin, Wo*Cout) bf16 and tiled bias (1, Wo*Cout) f32.
    """
    KH, KW, Cin = dw_w.shape
    Cout = pw_w.shape[1]
    Wp = W + 2 * padding
    Wo = (W + 2 * padding - dilation * (KW - 1) - 1) // stride + 1

    # Wc[kh, kw, ci, co] = dw_w[kh, kw, ci] * pw_w[ci, co]
    Wc = dw_w[:, :, :, None] * pw_w[None, None, :, :]              # (KH, KW, Cin, Cout)
    # S[kw, w, ow] = 1 iff w == ow*stride + kw*dilation  (encodes the kw-tap + column stride)
    S = np.zeros((KW, Wp, Wo), np.float32)
    for kw in range(KW):
        for ow in range(Wo):
            S[kw, ow * stride + kw * dilation, ow] = 1.0
    B = jnp.einsum("kpo,hkcd->hpcod", jnp.asarray(S), Wc)          # (KH, Wp, Cin, Wo, Cout)
    B = B.reshape(KH, Wp * Cin, Wo * Cout).astype(jnp.bfloat16)    # banded weights, bf16 for MXU

    # Combined bias: (depthwise + dw_b) @ pw_w + pw_b == depthwise @ pw_w + (dw_b@pw_w + pw_b)
    b_comb = (dw_b @ pw_w + pw_b).astype(jnp.float32)              # (Cout,)
    b_tiled = jnp.tile(b_comb, Wo).reshape(1, Wo * Cout)           # (1, Wo*Cout)
    return B, b_tiled


@functools.partial(jax.jit, static_argnames=("kernel_size", "stride", "padding", "dilation"))
def dilconv_forward(x_nhwc, B, b_tiled, *, kernel_size, stride, padding, dilation):
    """x_nhwc: (N, H, W, Cin).  B/b_tiled from build_dilconv_params.  Returns (N, Ho, Wo, Cout)."""
    N, H, W, Cin = x_nhwc.shape
    KH = B.shape[0]
    WpC = B.shape[1]
    WoC = B.shape[2]
    Hp = H + 2 * padding
    Wp = W + 2 * padding
    assert WpC == Wp * Cin, "banded weights were built for a different W/padding/Cin"
    Ho = (H + 2 * padding - dilation * (kernel_size - 1) - 1) // stride + 1
    Wo = (W + 2 * padding - dilation * (kernel_size - 1) - 1) // stride + 1
    Cout = WoC // Wo

    # VMEM sanity (v7x has only 64 MiB): the banded weight grows as O(W^2 * Cin * Cout).
    # At the tested shape it is ~61 KiB; guard against silent OOM if shapes grow.
    banded_bytes = KH * WpC * WoC * 2
    if banded_bytes > 24 * 1024 * 1024:
        # TODO(synk): implement a per-tap im2col matmul path for very large W*Cin*Wo*Cout.
        raise ValueError("banded weight too large for VMEM; use a per-tap im2col matmul instead")

    # Zero padding before ReLU is valid: ReLU(0)=0 and all biases are added after the matmul.
    x_pad = jnp.pad(x_nhwc, ((0, 0), (padding, padding), (padding, padding), (0, 0)))
    x_flat = x_pad.reshape(N, Hp, WpC)

    if stride == 1:
        # Hp == Ho + dilation*(KH-1): taps are overlapping contiguous slices of the same rows.
        x_in = x_flat
        rows_in = Hp
        tap_offsets = tuple(k * dilation for k in range(KH))
    else:
        # Pre-gather strided rows per tap (fused into the jitted wrapper) so the kernel only
        # ever does contiguous, unit-stride row slices.
        row_idx = np.asarray(
            [oh * stride + k * dilation for k in range(KH) for oh in range(Ho)], np.int32)
        x_in = jnp.take(x_flat, jnp.asarray(row_idx), axis=1)      # (N, KH*Ho, WpC)
        rows_in = KH * Ho
        tap_offsets = tuple(k * Ho for k in range(KH))

    kernel = functools.partial(_dilconv_kernel, tap_offsets=tap_offsets, out_rows=Ho)

    out_flat = pl.pallas_call(
        kernel,
        out_shape=jax.ShapeDtypeStruct((N, Ho, WoC), jnp.float32),
        grid=(N,),  # one grid step per batch element
        in_specs=[
            # all padded rows of one batch element
            pl.BlockSpec((None, rows_in, WpC), lambda n: (n, 0, 0)),
            # grid-invariant weights / bias (double-buffers are ~2x61 KiB here, so we skip
            # pl.Buffered(1) plumbing -- pure VMEM hygiene with no perf impact at this size)
            pl.BlockSpec((KH, WpC, WoC), lambda n: (0, 0, 0)),
            pl.BlockSpec((1, WoC), lambda n: (0, 0)),
        ],
        out_specs=pl.BlockSpec((None, Ho, WoC), lambda n: (n, 0, 0)),
        compiler_params=pltpu.CompilerParams(
            # Batch axis kept "parallel": shards one batch element per TensorCore on v7x.
            # (Folding N into a single grid step would save ~0.35us on v5e/v6e but serialize v7x.)
            dimension_semantics=("parallel",),
            # Total footprint ~0.2 MiB -- fits every generation; limit kept modest.
            vmem_limit_bytes=32 * 1024 * 1024),
    )(x_in, B, b_tiled)

    return out_flat.reshape(N, Ho, Wo, Cout)


def dilconv_reference(x_nhwc, dw_w, dw_b, pw_w, pw_b, *, stride, padding, dilation):
    """Pure-JAX f32 reference using lax.conv_general_dilated (for verification)."""
    Cin = x_nhwc.shape[-1]
    y = jnp.maximum(x_nhwc, 0.0)
    dw_hwio = dw_w.reshape(dw_w.shape[0], dw_w.shape[1], 1, Cin)
    y = jax.lax.conv_general_dilated(
        y, dw_hwio,
        window_strides=(stride, stride),
        padding=((padding, padding), (padding, padding)),
        rhs_dilation=(dilation, dilation),
        dimension_numbers=("NHWC", "HWIO", "NHWC"),
        feature_group_count=Cin,
    ) + dw_b[None, None, None, :]
    y = jnp.einsum("nhwc,cd->nhwd", y, pw_w) + pw_b[None, None, None, :]
    return y


def _run_case(N, Cin, H, W, Cout, K, stride, pad, dil, key):
    k_x, k_dw, k_dwb, k_pw, k_pwb = jax.random.split(key, 5)

    # PyTorch input is NCHW; generate then transpose to NHWC for the kernel.
    x_nchw = jax.random.normal(k_x, (N, Cin, H, W), dtype=jnp.float32)
    x_nhwc = jnp.transpose(x_nchw, (0, 2, 3, 1))

    # Synthetic parameters (PyTorch layouts would be dw (Cin,1,K,K) -> (K,K,Cin),
    # pw (Cout,Cin,1,1) -> (Cin,Cout)).
    dw_w = jax.random.normal(k_dw, (K, K, Cin), dtype=jnp.float32) * 0.1
    dw_b = jax.random.normal(k_dwb, (Cin,), dtype=jnp.float32) * 0.1
    pw_w = jax.random.normal(k_pw, (Cin, Cout), dtype=jnp.float32) * 0.1
    pw_b = jax.random.normal(k_pwb, (Cout,), dtype=jnp.float32) * 0.1

    # Parameter-only precompute (once), then the jitted per-call path.
    B, b_tiled = build_dilconv_params(dw_w, dw_b, pw_w, pw_b,
                                      W=W, stride=stride, padding=pad, dilation=dil)
    out = dilconv_forward(x_nhwc, B, b_tiled, kernel_size=K,
                          stride=stride, padding=pad, dilation=dil)
    out = jax.block_until_ready(out)

    ref = dilconv_reference(x_nhwc, dw_w, dw_b, pw_w, pw_b,
                            stride=stride, padding=pad, dilation=dil)
    Ho = (H + 2 * pad - dil * (K - 1) - 1) // stride + 1
    Wo = (W + 2 * pad - dil * (K - 1) - 1) // stride + 1
    assert out.shape == (N, Ho, Wo, Cout), out.shape
    # bf16 MXU operands with f32 accumulation -> compare against the f32 reference loosely.
    np.testing.assert_allclose(np.asarray(out), np.asarray(ref), rtol=1e-2, atol=1e-2)


if __name__ == "__main__":
    key = jax.random.PRNGKey(0)
    k1, k2 = jax.random.split(key)

    # Spec config: DilConv(C_in=4, C_out=8, kernel_size=3, stride=1, padding=2, dilation=2, bn=False)
    _run_case(N=2, Cin=4, H=16, W=16, Cout=8, K=3, stride=1, pad=2, dil=2, key=k1)
    # Exercise the stride>1 / odd-output-size path (previously untested).
    _run_case(N=2, Cin=4, H=13, W=13, Cout=8, K=3, stride=2, pad=2, dil=2, key=k2)

    print("KERNEL_OK")
</pallas_src>

<mosaic_0001>
module attributes {stable_mosaic.version = 11 : i64} {
  func.func @_dilconv_kernel(%arg0: i32, %arg1: memref<1x20x80xf32, #tpu.memory_space<vmem>>, %arg2: memref<3x80x128xbf16, #tpu.memory_space<vmem>>, %arg3: memref<1x128xf32, #tpu.memory_space<vmem>>, %arg4: memref<1x16x128xf32, #tpu.memory_space<vmem>>) attributes {dimension_semantics = [#tpu.dimension_semantics<parallel>], iteration_bounds = array<i64: 2>, scalar_prefetch = 0 : i64, scratch_operands = 0 : i64, tpu.core_type = #tpu.core_type<tc>, window_params = [{transform_indices = @transform_0, window_bounds = array<i64: 1, 20, 80>}, {pipeline_mode = #tpu.pipeline_mode<synchronous>, transform_indices = @transform_1, window_bounds = array<i64: 3, 80, 128>}, {pipeline_mode = #tpu.pipeline_mode<synchronous>, transform_indices = @transform_2, window_bounds = array<i64: 1, 128>}, {transform_indices = @transform_3, window_bounds = array<i64: 1, 16, 128>}]} {
    %c0 = arith.constant 0 : index
    %c0_0 = arith.constant 0 : index
    %c0_1 = arith.constant 0 : index
    %0 = vector.load %arg1[%c0, %c0_0, %c0_1] : memref<1x20x80xf32, #tpu.memory_space<vmem>>, vector<1x20x80xf32>
    %1 = vector.shape_cast %0 : vector<1x20x80xf32> to vector<20x80xf32>
    %cst = arith.constant 0.000000e+00 : f32
    %2 = vector.broadcast %cst : f32 to vector<20x80xf32>
    %3 = arith.maximumf %1, %2 : vector<20x80xf32>
    %c0_2 = arith.constant 0 : index
    %c0_3 = arith.constant 0 : index
    %4 = vector.load %arg3[%c0_2, %c0_3] : memref<1x128xf32, #tpu.memory_space<vmem>>, vector<1x128xf32>
    %5 = vector.shape_cast %4 : vector<1x128xf32> to vector<1x128xf32>
    %6 = vector.broadcast %5 : vector<1x128xf32> to vector<16x128xf32>
    %7 = vector.extract_strided_slice %3 {offsets = [0, 0], sizes = [16, 80], strides = [1, 1]} : vector<20x80xf32> to vector<16x80xf32>
    %8 = arith.truncf %7 : vector<16x80xf32> to vector<16x80xbf16>
    %c0_4 = arith.constant 0 : index
    %c0_5 = arith.constant 0 : index
    %c0_6 = arith.constant 0 : index
    %9 = vector.load %arg2[%c0_4, %c0_5, %c0_6] : memref<3x80x128xbf16, #tpu.memory_space<vmem>>, vector<1x80x128xbf16>
    %10 = vector.shape_cast %9 : vector<1x80x128xbf16> to vector<80x128xbf16>
    %cst_7 = arith.constant dense<0.000000e+00> : vector<16x128xf32>
    %11 = tpu.matmul %8, %10, %cst_7 {dimension_numbers = #tpu.dot_dimension_numbers<[1], [0], [0], [1], [0, 0, 1, 1], [], []>} : vector<16x80xbf16>, vector<80x128xbf16>, vector<16x128xf32> -> vector<16x128xf32>
    %12 = arith.addf %6, %11 : vector<16x128xf32>
    %13 = vector.extract_strided_slice %3 {offsets = [2, 0], sizes = [16, 80], strides = [1, 1]} : vector<20x80xf32> to vector<16x80xf32>
    %14 = arith.truncf %13 : vector<16x80xf32> to vector<16x80xbf16>
    %c1 = arith.constant 1 : index
    %c0_8 = arith.constant 0 : index
    %c0_9 = arith.constant 0 : index
    %15 = vector.load %arg2[%c1, %c0_8, %c0_9] : memref<3x80x128xbf16, #tpu.memory_space<vmem>>, vector<1x80x128xbf16>
    %16 = vector.shape_cast %15 : vector<1x80x128xbf16> to vector<80x128xbf16>
    %cst_10 = arith.constant dense<0.000000e+00> : vector<16x128xf32>
    %17 = tpu.matmul %14, %16, %cst_10 {dimension_numbers = #tpu.dot_dimension_numbers<[1], [0], [0], [1], [0, 0, 1, 1], [], []>} : vector<16x80xbf16>, vector<80x128xbf16>, vector<16x128xf32> -> vector<16x128xf32>
    %18 = arith.addf %12, %17 : vector<16x128xf32>
    %19 = vector.extract_strided_slice %3 {offsets = [4, 0], sizes = [16, 80], strides = [1, 1]} : vector<20x80xf32> to vector<16x80xf32>
    %20 = arith.truncf %19 : vector<16x80xf32> to vector<16x80xbf16>
    %c2 = arith.constant 2 : index
    %c0_11 = arith.constant 0 : index
    %c0_12 = arith.constant 0 : index
    %21 = vector.load %arg2[%c2, %c0_11, %c0_12] : memref<3x80x128xbf16, #tpu.memory_space<vmem>>, vector<1x80x128xbf16>
    %22 = vector.shape_cast %21 : vector<1x80x128xbf16> to vector<80x128xbf16>
    %cst_13 = arith.constant dense<0.000000e+00> : vector<16x128xf32>
    %23 = tpu.matmul %20, %22, %cst_13 {dimension_numbers = #tpu.dot_dimension_numbers<[1], [0], [0], [1], [0, 0, 1, 1], [], []>} : vector<16x80xbf16>, vector<80x128xbf16>, vector<16x128xf32> -> vector<16x128xf32>
    %24 = arith.addf %18, %23 : vector<16x128xf32>
    %c0_14 = arith.constant 0 : index
    %c0_15 = arith.constant 0 : index
    %c0_16 = arith.constant 0 : index
    %25 = vector.load %arg4[%c0_14, %c0_15, %c0_16] : memref<1x16x128xf32, #tpu.memory_space<vmem>>, vector<1x16x128xf32>
    %26 = vector.shape_cast %25 : vector<1x16x128xf32> to vector<16x128xf32>
    %27 = vector.shape_cast %24 : vector<16x128xf32> to vector<1x16x128xf32>
    tpu.vector_store %arg4[%c0_14, %c0_15, %c0_16], %27 {strides = array<i32>} : memref<1x16x128xf32, #tpu.memory_space<vmem>>, vector<1x16x128xf32>,
    return
  }
  func.func @transform_0(%arg0: i32) -> (i32, i32, i32) {
    %c0_i32 = arith.constant 0 : i32
    %c0_i32_0 = arith.constant 0 : i32
    %c0_i32_1 = arith.constant 0 : i32
    return %arg0, %c0_i32, %c0_i32_0 : i32, i32, i32
  }
  func.func @transform_1(%arg0: i32) -> (i32, i32, i32) {
    %c0_i32 = arith.constant 0 : i32
    %c0_i32_0 = arith.constant 0 : i32
    %c0_i32_1 = arith.constant 0 : i32
    %c0_i32_2 = arith.constant 0 : i32
    return %c0_i32, %c0_i32_0, %c0_i32_1 : i32, i32, i32
  }
  func.func @transform_2(%arg0: i32) -> (i32, i32) {
    %c0_i32 = arith.constant 0 : i32
    %c0_i32_0 = arith.constant 0 : i32
    %c0_i32_1 = arith.constant 0 : i32
    return %c0_i32, %c0_i32_0 : i32, i32
  }
  func.func @transform_3(%arg0: i32) -> (i32, i32, i32) {
    %c0_i32 = arith.constant 0 : i32
    %c0_i32_0 = arith.constant 0 : i32
    %c0_i32_1 = arith.constant 0 : i32
    return %arg0, %c0_i32, %c0_i32_0 : i32, i32, i32
  }
}

</mosaic_0001>

<bundles_post_ra>
// kernel: dilconv_forward.1
= control target key start
LH: loop header
LB: loop body
LE: loop exit
PB: predicated region body
PF: predicated region fallthrough
CT: control target
= control target key end

     0   :  { %s578_s12 = smov 0   ;;  %s647_s0 = inlined_call_operand.vmem [shape: f32[2,20,80], index: 0, kind: input, shape index: {}]   ;;  %s648_s1 = inlined_call_operand.vmem [shape: bf16[3,80,128], index: 1, kind: input, shape index: {}]   ;;  %s649_s2 = inlined_call_operand.vmem [shape: f32[1,128], index: 2, kind: input, shape index: {}]   ;;  %s650_s3 = inlined_call_operand.vmem [shape: f32[2,16,128], index: 3, kind: output, shape index: {}]  }
   0x1 LB: > { %s431_s13 = sadd.s32 4294967295, %s556_s12   ;;  %p435_p0 = scmp.ge.s32.totalorder %s556_s12, 1  ;;  %s556_s12 = sphi %s578_s12, %s13_s12  }
   0x2   : > { %p137_p1 = scmp.lt.s32.totalorder %s556_s12, 3 }
   0x4   : > { %p138_p2 = pnand %p435_p0, %p137_p1 }
   0x5   : > { %p161_p3 = scmp.lt.s32.totalorder (!%p138_p2), %s431_s13, 1 }
   0x6   : > { %141 = sbr.rel (%p138_p2) target bundleno = 175 (0xaf), region = 32 }
   0xb   : > { %v529_v0 = vld [vmem:[%s648_s1 + $0x20] sm:$0xff]  ;;  %v534_v1 = vld [vmem:[%s648_s1 + $0x48] sm:$0xff]  ;;  %v539_v2 = vld [vmem:[%s648_s1 + $0x70] sm:$0xff]  ;;  %s652_s13 = smov (!%p161_p3, %s431_s13), 1  ;;  %vm257_vm0 = vcmask 1046528   ;;  %vm321_vm1 = vcmask 1045504  }
   0xc   : > { %230 = vmatpush.bf16.msra.mxu0 %v529_v0  ;;  %297 = vmatpush.bf16.msra.mxu1 %v534_v1  ;;  %v528_v3 = vld [vmem:[%s648_s1 + $0x18] sm:$0xff]  ;;  %v533_v4 = vld [vmem:[%s648_s1 + $0x40] sm:$0xff]  ;;  %v538_v5 = vld [vmem:[%s648_s1 + $0x68] sm:$0xff]  ;;  %s540_s26 = smul.u32 24, %s652_s13  ;;  %vm223_vm2 = vcmask 654336   ;;  %s524_s25 = sshll.u32 %s652_s13, 4 }
   0xd   : > { %361 = vmatpush.bf16.msra.mxu2 %v539_v2  ;;  %v527_v6 = vld [vmem:[%s648_s1 + $0x10] sm:$0xff]  ;;  %v532_v7 = vld [vmem:[%s648_s1 + $0x38] sm:$0xff]  ;;  %v537_v8 = vld [vmem:[%s648_s1 + $0x60] sm:$0xff]  ;;  %s170_s28 = scalar_lea.vmem %s650_s3, %s524_s25 }
   0xe   : > { %s165_s8 = scalar_lea.vmem %s647_s0, %s540_s26  ;;  %v526_v15 = vld [vmem:[%s648_s1 + $0x8] sm:$0xff]  ;;  %v531_v16 = vld [vmem:[%s648_s1 + $0x30] sm:$0xff]  ;;  %v536_v19 = vld [vmem:[%s648_s1 + $0x58] sm:$0xff] }
   0xf   : > { %v172_v9 = vld [vmem:[%s165_s8] sm:$0xff]  ;;  %v173_v10 = vld [vmem:[%s165_s8 + $0x8] sm:$0xff]  ;;  %v174_v11 = vld [vmem:[%s165_s8 + $0x10] sm:$0xf] }
  0x10   : > { %231 = vmatpush.bf16.msra.mxu0 %v528_v3  ;;  %298 = vmatpush.bf16.msra.mxu1 %v533_v4  ;;  %v175_v12 = vmax.f32 %v172_v9, 0.0  ;;  %v176_v13 = vmax.f32 %v173_v10, 0.0  ;;  %v177_v14 = vmax.f32 %v174_v11, 0.0  ;;  %v525_v20 = vld [vmem:[%s648_s1] sm:$0xff]  ;;  %v530_v21 = vld [vmem:[%s648_s1 + $0x28] sm:$0xff]  ;;  %v535_v24 = vld [vmem:[%s648_s1 + $0x50] sm:$0xff] }
  0x11   : > { %362 = vmatpush.bf16.msra.mxu2 %v538_v5  ;;  %v549_v29 = vld [vmem:[%s649_s2] ss:$0 sm:$0xff] }
  0x12   : > { %v182_v17 = vpack.c.bf16 %v176_v13, %v175_v12  ;;  %v243_v18 = vpack.c.bf16 %v177_v14, %v177_v14 }
  0x14   : > { %232 = vmatpush.bf16.msra.mxu0 %v527_v6  ;;  %299 = vmatpush.bf16.msra.mxu1 %v532_v7  ;;  %v258_v22 = vrot.slane %v182_v17, 1  ;;  %v259_v23 = vrot.slane %v243_v18, 1  ;;  %v322_v25 = vrot.slane %v182_v17, 2  ;;  %v323_v26 = vrot.slane %v243_v18, 2 }
  0x15   : > { %363 = vmatpush.bf16.msra.mxu2 %v537_v8 }
  0x16   : > { %v260_v27 = vsel %vm257_vm0, %v258_v22, %v259_v23  ;;  %v324_v28 = vsel %vm321_vm1, %v322_v25, %v323_v26 }
  0x18   : > { %233 = vmatpush.bf16.msra.mxu0 %v526_v15  ;;  %300 = vmatpush.bf16.msra.mxu1 %v531_v16 }
  0x19   : > { %364 = vmatpush.bf16.msra.mxu2 %v536_v19 }
  0x1c   : > { %234 = vmatpush.bf16.msra.mxu0 %v525_v20  ;;  %301 = vmatpush.bf16.msra.mxu1 %v530_v21 }
  0x1d   : > { %365 = vmatpush.bf16.msra.mxu2 %v535_v24 }
  0x1f   : > { %459 = vmatmul.msk.bf16.vlgmr.msra.gmra.mxu0 %vm223_vm2, %v182_v17  ;;  %490 = vmatmul.msk.bf16.vlgmr.msra.gmra.mxu1 %vm223_vm2, %v260_v27 }
  0x20   : > { %521 = vmatmul.msk.bf16.vlgmr.msra.gmra.mxu2 %vm223_vm2, %v324_v28 }
  0x9c   : > { %v236_v30 = vpop.f32.mrf.mxu0  ;;  %v303_v32 = vpop.f32.mrf.mxu1 }
  0x9d   : > { %v241_v31 = vadd.f32 %v549_v29, %v236_v30 }
  0x9f   : > { %v308_v33 = vadd.f32 %v303_v32, %v241_v31 }
  0xa3   : > { %v367_v34 = vpop.f32.mrf.mxu2 }
  0xa4   : > { %v372_v35 = vadd.f32 %v367_v34, %v308_v33  ;;  %v238_v36 = vpop.f32.mrf.mxu0  ;;  %v305_v38 = vpop.f32.mrf.mxu1 }
  0xa5   : > { %v242_v37 = vadd.f32 %v549_v29, %v238_v36 }
  0xa6   : > { %374 = vst [vmem:[%s170_s28] sm:$0xff] %v372_v35 }
  0xa7   : > { %v309_v39 = vadd.f32 %v305_v38, %v242_v37 }
  0xab   : > { %v369_v40 = vpop.f32.mrf.mxu2 }
  0xac   : > { %v373_v41 = vadd.f32 %v369_v40, %v309_v39 }
  0xae   : > { %375 = vst [vmem:[%s170_s28 + $0x8] sm:$0xff] %v373_v41 }
  0xaf PF: > { %s13_s12 = sadd.s32 1, %s556_s12  }
  0xb0   : > { %p10_p4 = scmp.ge.s32.totalorder %s13_s12, 4  }
  0xb2   :  { %12 = sbr.rel (!%p10_p4) target bundleno = 1 (0x1), region = 64 }

</bundles_post_ra>
